<compile_context>
chip_gen: v6e
topology: v6e:2x2x1
jax: 0.10.0
libtpu: 0.0.40
codegen_flags: <defaults>
</compile_context>

<pallas_src>
import functools

import jax
import jax.numpy as jnp
from jax.experimental import pallas as pl
from jax.experimental.pallas import tpu as pltpu


def _layernorm_kernel(x_ref, gamma_ref, beta_ref, o_ref, *, epsilon, features):
    x = x_ref[...].astype(jnp.float32)                       # (T, F)
    gamma = gamma_ref[...].astype(jnp.float32)                # (1, F)
    beta = beta_ref[...].astype(jnp.float32)                  # (1, F)

    # Fused single pass: both cross-lane reductions issued back to back so the
    # XLU units can overlap them.
    sum_x = jnp.sum(x, axis=-1, keepdims=True)                # (T, 1)
    sum_xx = jnp.sum(x * x, axis=-1, keepdims=True)           # (T, 1)

    mean = sum_x * (1.0 / features)
    # unbiased variance (PyTorch torch.std default: correction = 1)
    var = (sum_xx - sum_x * mean) / (features - 1)
    var = jnp.maximum(var, 0.0)                               # guard rounding
    std = jnp.sqrt(var)

    # Per-row reciprocal (EUP) instead of a full-tile divide (VALU).
    inv = pl.reciprocal(std + epsilon, approx=False)          # (T, 1)

    out = (x - mean) * inv * gamma + beta
    o_ref[...] = out.astype(o_ref.dtype)


def _vmem_capacity_bytes():
    try:
        return int(pltpu.get_tpu_info().vmem_capacity_bytes)
    except Exception:
        # Conservative fallback: v7x per-TensorCore VMEM.
        return 64 * 1024 * 1024


def _pick_tile_rows(rows, features, itemsize, vmem_cap):
    """Largest row tile that keeps double-buffered in/out tiles in budget."""
    min_tile = {1: 32, 2: 16}.get(itemsize, 8)   # sublane packing per dtype
    budget = vmem_cap // 4                       # headroom for intermediates
    # in + out tiles, each double-buffered; compute happens in f32.
    bytes_per_row = 4 * features * max(itemsize, 4)
    tile = budget // max(bytes_per_row, 1)
    tile = min(tile, 1024)                       # step overhead already amortized
    rows_rounded = -(-rows // min_tile) * min_tile
    tile = min(tile, rows_rounded)               # don't exceed the row count
    tile = max(min_tile, (tile // min_tile) * min_tile)
    return int(tile)


def layer_normalization(x, gamma, beta, epsilon=1e-08, tile_rows=None):
    """Layer norm over the last axis of x. x: (..., features)."""
    orig_shape = x.shape
    features = orig_shape[-1]
    x2 = x.reshape(-1, features)
    rows = x2.shape[0]
    itemsize = jnp.dtype(x2.dtype).itemsize

    vmem_cap = _vmem_capacity_bytes()
    if tile_rows is None:
        tile_rows = _pick_tile_rows(rows, features, itemsize, vmem_cap)
    vmem_limit = int(min(vmem_cap // 2, 100 * 1024 * 1024))

    gamma2 = gamma.reshape(1, features)
    beta2 = beta.reshape(1, features)

    grid = (pl.cdiv(rows, tile_rows),)   # last block may be partial (masked)

    kernel = functools.partial(
        _layernorm_kernel, epsilon=epsilon, features=features
    )

    out = pl.pallas_call(
        kernel,
        out_shape=jax.ShapeDtypeStruct((rows, features), x.dtype),
        grid_spec=pltpu.PrefetchScalarGridSpec(
            num_scalar_prefetch=0,
            grid=grid,
            in_specs=[
                pl.BlockSpec((tile_rows, features), lambda i: (i, 0)),
                pl.BlockSpec((1, features), lambda i: (0, 0)),
                pl.BlockSpec((1, features), lambda i: (0, 0)),
            ],
            out_specs=pl.BlockSpec((tile_rows, features), lambda i: (i, 0)),
        ),
        compiler_params=pltpu.CompilerParams(
            dimension_semantics=("parallel",),
            vmem_limit_bytes=vmem_limit,
        ),
    )(x2, gamma2, beta2)

    return out.reshape(orig_shape)


if __name__ == "__main__":
    key = jax.random.PRNGKey(0)
    batch, seq, hidden = 2, 8, 32

    x = jax.random.normal(key, (batch, seq, hidden), dtype=jnp.float32)

    # Deterministic parameter init matching the module's __init__:
    # gamma = ones(features), beta = zeros(features)
    gamma = jnp.ones((hidden,), dtype=jnp.float32)
    beta = jnp.zeros((hidden,), dtype=jnp.float32)

    out = layer_normalization(x, gamma, beta, epsilon=1e-08)
    out = jax.block_until_ready(out)

    # Reference in plain JAX (unbiased std, eps added to std).
    mean = jnp.mean(x, axis=-1, keepdims=True)
    std = jnp.sqrt(
        jnp.sum((x - mean) ** 2, axis=-1, keepdims=True) / (hidden - 1)
    )
    ref = gamma * (x - mean) / (std + 1e-08) + beta
    assert jnp.allclose(out, ref, atol=1e-5, rtol=1e-5), "mismatch vs reference"

    print("KERNEL_OK")
</pallas_src>

<mosaic_0001>
module attributes {stable_mosaic.version = 11 : i64} {
  func.func @_layernorm_kernel(%arg0: i32, %arg1: memref<16x32xf32, #tpu.memory_space<vmem>>, %arg2: memref<1x32xf32, #tpu.memory_space<vmem>>, %arg3: memref<1x32xf32, #tpu.memory_space<vmem>>, %arg4: memref<16x32xf32, #tpu.memory_space<vmem>>) attributes {dimension_semantics = [#tpu.dimension_semantics<parallel>], iteration_bounds = array<i64: 1>, scalar_prefetch = 0 : i64, scratch_operands = 0 : i64, tpu.core_type = #tpu.core_type<tc>, window_params = [{transform_indices = @transform_0, window_bounds = array<i64: 16, 32>}, {pipeline_mode = #tpu.pipeline_mode<synchronous>, transform_indices = @transform_1, window_bounds = array<i64: 1, 32>}, {pipeline_mode = #tpu.pipeline_mode<synchronous>, transform_indices = @transform_2, window_bounds = array<i64: 1, 32>}, {transform_indices = @transform_3, window_bounds = array<i64: 16, 32>}]} {
    %c0 = arith.constant 0 : index
    %c0_0 = arith.constant 0 : index
    %0 = vector.load %arg1[%c0, %c0_0] : memref<16x32xf32, #tpu.memory_space<vmem>>, vector<16x32xf32>
    %c0_1 = arith.constant 0 : index
    %c0_2 = arith.constant 0 : index
    %1 = vector.load %arg2[%c0_1, %c0_2] : memref<1x32xf32, #tpu.memory_space<vmem>>, vector<1x32xf32>
    %c0_3 = arith.constant 0 : index
    %c0_4 = arith.constant 0 : index
    %2 = vector.load %arg3[%c0_3, %c0_4] : memref<1x32xf32, #tpu.memory_space<vmem>>, vector<1x32xf32>
    %cst = arith.constant dense<0.000000e+00> : vector<16xf32>
    %3 = vector.multi_reduction <add>, %0, %cst [1] : vector<16x32xf32> to vector<16xf32>
    %4 = vector.shape_cast %3 : vector<16xf32> to vector<16x1xf32>
    %5 = arith.mulf %0, %0 : vector<16x32xf32>
    %cst_5 = arith.constant dense<0.000000e+00> : vector<16xf32>
    %6 = vector.multi_reduction <add>, %5, %cst_5 [1] : vector<16x32xf32> to vector<16xf32>
    %7 = vector.shape_cast %6 : vector<16xf32> to vector<16x1xf32>
    %cst_6 = arith.constant 3.125000e-02 : f32
    %8 = vector.broadcast %cst_6 : f32 to vector<16x1xf32>
    %9 = arith.mulf %4, %8 : vector<16x1xf32>
    %10 = arith.mulf %4, %9 : vector<16x1xf32>
    %11 = arith.subf %7, %10 : vector<16x1xf32>
    %cst_7 = arith.constant 3.100000e+01 : f32
    %12 = vector.broadcast %cst_7 : f32 to vector<16x1xf32>
    %13 = arith.divf %11, %12 : vector<16x1xf32>
    %cst_8 = arith.constant 0.000000e+00 : f32
    %14 = vector.broadcast %cst_8 : f32 to vector<16x1xf32>
    %15 = arith.maximumf %13, %14 : vector<16x1xf32>
    %16 = math.sqrt %15 : vector<16x1xf32>
    %cst_9 = arith.constant 9.99999993E-9 : f32
    %17 = vector.broadcast %cst_9 : f32 to vector<16x1xf32>
    %18 = arith.addf %16, %17 : vector<16x1xf32>
    %19 = tpu.reciprocal %18 : vector<16x1xf32> -> vector<16x1xf32>
    %20 = vector.broadcast %9 : vector<16x1xf32> to vector<16x32xf32>
    %21 = arith.subf %0, %20 : vector<16x32xf32>
    %22 = vector.broadcast %19 : vector<16x1xf32> to vector<16x32xf32>
    %23 = arith.mulf %21, %22 : vector<16x32xf32>
    %24 = vector.broadcast %1 : vector<1x32xf32> to vector<16x32xf32>
    %25 = arith.mulf %23, %24 : vector<16x32xf32>
    %26 = vector.broadcast %2 : vector<1x32xf32> to vector<16x32xf32>
    %27 = arith.addf %25, %26 : vector<16x32xf32>
    %c0_10 = arith.constant 0 : index
    %c0_11 = arith.constant 0 : index
    %28 = vector.load %arg4[%c0_10, %c0_11] : memref<16x32xf32, #tpu.memory_space<vmem>>, vector<16x32xf32>
    tpu.vector_store %arg4[%c0_10, %c0_11], %27 {strides = array<i32>} : memref<16x32xf32, #tpu.memory_space<vmem>>, vector<16x32xf32>,
    return
  }
  func.func @transform_0(%arg0: i32) -> (i32, i32) {
    %c0_i32 = arith.constant 0 : i32
    %c0_i32_0 = arith.constant 0 : i32
    return %arg0, %c0_i32 : i32, i32
  }
  func.func @transform_1(%arg0: i32) -> (i32, i32) {
    %c0_i32 = arith.constant 0 : i32
    %c0_i32_0 = arith.constant 0 : i32
    %c0_i32_1 = arith.constant 0 : i32
    return %c0_i32, %c0_i32_0 : i32, i32
  }
  func.func @transform_2(%arg0: i32) -> (i32, i32) {
    %c0_i32 = arith.constant 0 : i32
    %c0_i32_0 = arith.constant 0 : i32
    %c0_i32_1 = arith.constant 0 : i32
    return %c0_i32, %c0_i32_0 : i32, i32
  }
  func.func @transform_3(%arg0: i32) -> (i32, i32) {
    %c0_i32 = arith.constant 0 : i32
    %c0_i32_0 = arith.constant 0 : i32
    return %arg0, %c0_i32 : i32, i32
  }
}

</mosaic_0001>

<bundles_post_ra>
// kernel: tpu_custom_call.1
= control target key start
LH: loop header
LB: loop body
LE: loop exit
PB: predicated region body
PF: predicated region fallthrough
CT: control target
= control target key end

     0   :  { %8 = vsyncpa [#allocation3], 0  ;;  %s222_s0 = inlined_call_operand.hbm [shape: f32[16,32], index: 0, kind: input, shape index: {}]   ;;  %s223_s1 = inlined_call_operand.vmem [shape: f32[1,32], index: 1, kind: input, shape index: {}]   ;;  %s224_s2 = inlined_call_operand.vmem [shape: f32[1,32], index: 2, kind: input, shape index: {}]   ;;  %s225_s3 = inlined_call_operand.hbm [shape: f32[16,32], index: 3, kind: output, shape index: {}]  }
   0x1   :  { %9 = vsyncpa [#allocation4], 0  ;;  %s174_s12 = smov [#allocation2]  }
   0x2   :  { %s15_s13 = sshll.u32 %s174_s12, 4  ;;  %s16_s13 = int_to_ptr.vmem [resolvable:$true] %s15_s13 }
   0x3   :  { %s138_s14 = scalar_lea.vmem %s16_s13, 256  ;;  %p143_p1 = scmp.lt.s32.totalorder %s16_s13, %s16_s13 }
   0x4   :  { %p139_p0 = scmp.ne.s32.totalorder %s16_s13, %s138_s14  ;;  %p144_p2 = scmp.lt.s32.totalorder %s138_s14, %s138_s14 }
   0x6   :  { %p145_p3 = por %p144_p2, %p143_p1 }
   0x8   :  { %p146_p4 = pnand %p145_p3, %p139_p0 }
   0xa   :  { %149 = shalt.err (!%p146_p4)
}
   0xb   :  { %s175_s15 = smov 128   ;;  %s176_s16 = smov 8  }
   0xc   :  { %21 = dma.hbm_to_vmem [thread:$0]  %s222_s0, 256, %s16_s13, [#allocation3], %s175_s15, %s175_s15, %s176_s16  }
   0xd   :  { %170 = dma.done.wait [#allocation3], 256  }
   0xe   :  { %171 = vsyncadd [#allocation3], 4294967040  ;;  %vm33_vm0 = vcmask 261120   ;;  %v29_v0 = vld [vmem:[#allocation2] sm:$0xff]  ;;  %v30_v1 = vld [vmem:[#allocation2 + $0x8] sm:$0xff]  ;;  %s177_s22 = smov [#allocation5]  }
   0xf   :  { %v34_v2 = vsel %vm33_vm0, %v29_v0, 0.0  ;;  %v40_v3 = vmul.f32 %v29_v0, %v29_v0  ;;  %v41_v4 = vmul.f32 %v30_v1, %v30_v1  ;;  %v37_v6 = vsel %vm33_vm0, %v30_v1, 0.0  ;;  %v116_v36 = vld [vmem:[%s223_s1] ss:$0 sm:$0xff]  ;;  %s104_s23 = sshll.u32 %s177_s22, 4  ;;  %s105_s23 = int_to_ptr.vmem [resolvable:$true] %s104_s23 }
  0x10   :  { %35 = vadd.xlane.f32.xlu0 %v34_v2  ;;  %v117_v38 = vld [vmem:[%s224_s2] ss:$0 sm:$0xff]  ;;  %s150_s1 = scalar_lea.vmem %s105_s23, 256  ;;  %p155_p6 = scmp.lt.s32.totalorder %s105_s23, %s105_s23 }
  0x11   :  { %v42_v5 = vsel %vm33_vm0, %v40_v3, 0.0  ;;  %v45_v7 = vsel %vm33_vm0, %v41_v4, 0.0  ;;  %p151_p5 = scmp.ne.s32.totalorder %s105_s23, %s150_s1  ;;  %p156_p7 = scmp.lt.s32.totalorder %s150_s1, %s150_s1 }
  0x12   :  { %43 = vadd.xlane.f32.xlu1 %v42_v5 }
  0x13   :  { %p157_p8 = por %p156_p7, %p155_p6 }
  0x14   :  { %38 = vadd.xlane.f32.xlu0 %v37_v6 }
  0x15   :  { %p158_p9 = pnand %p157_p8, %p151_p5 }
  0x16   :  { %46 = vadd.xlane.f32.xlu1 %v45_v7 }
  0x99   :  { %v36_v8 = vpop.xlane.xlu0 %35 }
  0x9a   :  { %v48_v9 = vmul.f32 0.03125, %v36_v8 }
  0x9b   :  { %v44_v10 = vpop.xlane.xlu1 %43 }
  0x9c   :  { %v50_v11 = vmul.f32 %v48_v9, %v36_v8  ;;  %v77_v34 = vsub.f32 %v29_v0, %v48_v9 }
  0x9d   :  { %v39_v12 = vpop.xlane.xlu0 %38 }
  0x9e   :  { %v52_v13 = vsub.f32 %v44_v10, %v50_v11  ;;  %v49_v14 = vmul.f32 0.03125, %v39_v12 }
  0x9f   :  { %v47_v15 = vpop.xlane.xlu1 %46 }
  0xa0   :  { %v55_v16 = vmul.f32 0.032258064, %v52_v13  ;;  %v51_v17 = vmul.f32 %v49_v14, %v39_v12  ;;  %v78_v40 = vsub.f32 %v30_v1, %v49_v14 }
  0xa2   :  { %v57_v18 = vmax.f32 %v55_v16, 0.0  ;;  %v53_v19 = vsub.f32 %v47_v15, %v51_v17 }
  0xa4   :  { %122 = vrsqrt.f32 %v57_v18  ;;  %v56_v20 = vmul.f32 0.032258064, %v53_v19  ;;  %vm61_vm1 = vcmp.eq.f32.partialorder %v57_v18, inf  ;;  %v64_v24 = vand.u32 2147483648, %v57_v18 }
  0xa5   :  { %vm63_vm2 = vcmp.eq.f32.partialorder %v57_v18, 0.0 }
  0xa6   :  { %v58_v21 = vmax.f32 %v56_v20, 0.0 }
  0xa8   :  { %124 = vrsqrt.f32 %v58_v21  ;;  %vm68_vm3 = vcmp.eq.f32.partialorder %v58_v21, inf  ;;  %v71_v30 = vand.u32 2147483648, %v58_v21  ;;  %vm70_vm4 = vcmp.eq.f32.partialorder %v58_v21, 0.0 }
  0xb1   :  { %v123_v22 = vpop.eup %122 }
  0xb2   :  { %v60_v23 = vmul.f32 %v123_v22, %v57_v18 }
  0xb4   :  { %v62_v25 = vsel %vm61_vm1, %v57_v18, %v60_v23 }
  0xb5   :  { %v65_v26 = vsel %vm63_vm2, %v64_v24, %v62_v25  ;;  %v125_v27 = vpop.eup %124 }
  0xb6   :  { %v73_v28 = vadd.f32 1e-08, %v65_v26  ;;  %v67_v29 = vmul.f32 %v125_v27, %v58_v21 }
  0xb8   :  { %126 = vrcp.f32 %v73_v28  ;;  %v69_v31 = vsel %vm68_vm3, %v58_v21, %v67_v29 }
  0xb9   :  { %v72_v32 = vsel %vm70_vm4, %v71_v30, %v69_v31 }
  0xba   :  { %v74_v33 = vadd.f32 1e-08, %v72_v32 }
  0xbc   :  { %128 = vrcp.f32 %v74_v33 }
  0xc5   :  { %v127_v35 = vpop.eup %126 }
  0xc6   :  { %v79_v37 = vmul.f32 %v127_v35, %v77_v34 }
  0xc8   :  { %v87_v39 = vmul.f32 %v116_v36, %v79_v37 }
  0xc9   :  { %v129_v41 = vpop.eup %128 }
  0xca   :  { %v95_v42 = vadd.f32 %v117_v38, %v87_v39  ;;  %v80_v43 = vmul.f32 %v129_v41, %v78_v40 }
  0xcc   :  { %97 = vst.msk [vmem:[#allocation5] sm:$0xff] %vm33_vm0, %v95_v42  ;;  %v88_v44 = vmul.f32 %v116_v36, %v80_v43 }
  0xce   :  { %v96_v45 = vadd.f32 %v117_v38, %v88_v44 }
  0xd0   :  { %98 = vst.msk [vmem:[#allocation5 + $0x8] sm:$0xff] %vm33_vm0, %v96_v45 }
  0xd1   :  { %161 = shalt.err (!%p158_p9)
}
  0xd2   :  { %110 = dma.vmem_to_hbm [thread:$0]  %s105_s23, 256, %s225_s3, [#allocation4], %s175_s15, %s175_s15, %s176_s16  }
  0xd3   :  { %172 = dma.done.wait [#allocation4], 256  }
  0xd4   :  { %173 = vsyncadd [#allocation4], 4294967040 }
  0xd5   :  { %114 = vsyncpa [#allocation3], 1 }
  0xd6   :  { %115 = vsyncpa [#allocation4], 1 }

</bundles_post_ra>
